<compile_context>
chip_gen: v5e
topology: v5e:2x2
jax: 0.10.0
libtpu: 0.0.40
codegen_flags: <defaults>
</compile_context>

<pallas_src>
import jax
import jax.numpy as jnp
from jax.experimental import pallas as pl
from jax.experimental.pallas import tpu as pltpu


def _relu_kernel(x_ref, o_ref):
    zero = jnp.zeros((), dtype=x_ref.dtype)
    o_ref[...] = jnp.maximum(x_ref[...], zero)


def _chip_params():
    """Per-generation tile-size parameters (conservative fallback = v5e)."""
    try:
        kind = jax.devices()[0].device_kind.lower()
    except Exception:  # pragma: no cover - defensive
        kind = ""
    if "v7" in kind:
        # 64 MiB VMEM/TC, 2 TCs: 4 MiB blocks (2 specs x 2 bufs = 16 MiB),
        # small single-block cutoff so mid-size slabs split across both TCs.
        return dict(block_bytes=4 << 20, cutoff=512 << 10, min_steps=4,
                    vmem_limit=48 << 20)
    if "v6" in kind:
        # 128 MiB VMEM, 32 MiB scoped default: 8 MiB blocks need the limit raised.
        return dict(block_bytes=8 << 20, cutoff=1 << 20, min_steps=2,
                    vmem_limit=64 << 20)
    # v5e / unknown: 16 MiB scoped VMEM default -> 2 MiB blocks fit double-buffered.
    return dict(block_bytes=2 << 20, cutoff=1 << 20, min_steps=2,
                vmem_limit=None)


def _relu_impl(x: jax.Array) -> jax.Array:
    orig_shape = x.shape
    dtype = x.dtype
    total = x.size
    itemsize = jnp.dtype(dtype).itemsize
    sublane = max(8, 32 // itemsize)  # 8 for f32, 16 for bf16, 32 for int8/fp8

    p = _chip_params()
    block_bytes, cutoff, min_steps, vmem_limit = (
        p["block_bytes"], p["cutoff"], p["min_steps"], p["vmem_limit"])

    # Widest lane width (multiple of 128) that exactly divides the flat size:
    # reshape is then a pure bitcast (no relayout copy) and stores stay
    # unmasked / lane-dense.
    lanes = None
    for cand in (1024, 512, 256, 128):
        if total % cand == 0:
            lanes = cand
            break

    pad = 0
    if lanes is None:
        # Odd flat size: pad to the next multiple of 1024 and stay on the
        # lane-dense tiled path (avoids masked vst.msk stores and the
        # whole-array-block VMEM-OOM trap of the old fallback).
        lanes = 1024
        pad = (-total) % lanes
        x2d = jnp.pad(x.reshape(-1), (0, pad)).reshape((total + pad) // lanes, lanes)
    else:
        x2d = x.reshape(total // lanes, lanes)

    rows, cols = x2d.shape
    slab_bytes = rows * cols * itemsize

    if slab_bytes <= cutoff or rows < 2 * sublane:
        # Small input: one block covering the whole slab, single grid step
        # (full-array dims are exempt from the (8,128) divisibility rule).
        block_rows = rows
        grid = (1,)
    else:
        # Large input: big sublane-aligned row tiles, but at least `min_steps`
        # grid steps so DMA overlaps compute (and both TCs are used on v7x).
        target_rows = max(sublane, block_bytes // (cols * itemsize))
        target_rows = min(target_rows, pl.cdiv(rows, min_steps))
        block_rows = max(sublane, (target_rows // sublane) * sublane)
        block_rows = min(block_rows, rows)
        grid = (pl.cdiv(rows, block_rows),)

    out2d = pl.pallas_call(
        _relu_kernel,
        out_shape=jax.ShapeDtypeStruct((rows, cols), dtype),
        grid=grid,
        in_specs=[pl.BlockSpec((block_rows, cols), lambda i: (i, 0))],
        out_specs=pl.BlockSpec((block_rows, cols), lambda i: (i, 0)),
        input_output_aliases={0: 0},  # in-place: donate input buffer to output
        compiler_params=pltpu.CompilerParams(
            dimension_semantics=("parallel",),
            vmem_limit_bytes=vmem_limit,
        ),
        cost_estimate=pl.CostEstimate(
            flops=rows * cols,
            transcendentals=0,
            bytes_accessed=2 * rows * cols * itemsize,
        ),
    )(x2d)

    out_flat = out2d.reshape(-1)
    if pad:
        out_flat = out_flat[:total]
    return out_flat.reshape(orig_shape)


# NOTE: the input buffer of the inner pallas_call is aliased to its output
# (in-place semantics); under jit the aliased operand is an intermediate, so
# callers of relu_pallas may still safely reuse their input array.
relu_pallas = jax.jit(_relu_impl)


if __name__ == "__main__":
    key = jax.random.PRNGKey(0)

    # Shape from the module's forward: NCHW [1, 256, 14, 14] (~196 KiB f32).
    x232 = jax.random.normal(key, (1, 256, 14, 14), dtype=jnp.float32)
    ref = jnp.maximum(x232, 0.0)  # reference computed before the kernel call

    x233 = relu_pallas(x232)
    jax.block_until_ready(x233)

    assert x233.shape == x232.shape
    assert x233.dtype == x232.dtype
    assert jnp.array_equal(x233, ref)

    # Also exercise the padded (odd flat size) path for robustness.
    x_odd = jax.random.normal(jax.random.PRNGKey(1), (2, 3, 7, 5), dtype=jnp.float32)
    ref_odd = jnp.maximum(x_odd, 0.0)
    out_odd = relu_pallas(x_odd)
    jax.block_until_ready(out_odd)
    assert out_odd.shape == x_odd.shape
    assert jnp.array_equal(out_odd, ref_odd)

    print("KERNEL_OK")
</pallas_src>

<mosaic_0001>
module attributes {stable_mosaic.version = 11 : i64} {
  func.func @_relu_kernel(%arg0: i32, %arg1: memref<49x1024xf32, #tpu.memory_space<vmem>>, %arg2: memref<49x1024xf32, #tpu.memory_space<vmem>>) attributes {dimension_semantics = [#tpu.dimension_semantics<parallel>], iteration_bounds = array<i64: 1>, scalar_prefetch = 0 : i64, scratch_operands = 0 : i64, tpu.core_type = #tpu.core_type<tc>, window_params = [{transform_indices = @transform_0, window_bounds = array<i64: 49, 1024>}, {transform_indices = @transform_1, window_bounds = array<i64: 49, 1024>}]} {
    %c0 = arith.constant 0 : index
    %c0_0 = arith.constant 0 : index
    %0 = vector.load %arg1[%c0, %c0_0] : memref<49x1024xf32, #tpu.memory_space<vmem>>, vector<49x1024xf32>
    %cst = arith.constant 0.000000e+00 : f32
    %1 = vector.broadcast %cst : f32 to vector<49x1024xf32>
    %2 = arith.maximumf %0, %1 : vector<49x1024xf32>
    %c0_1 = arith.constant 0 : index
    %c0_2 = arith.constant 0 : index
    %3 = vector.load %arg2[%c0_1, %c0_2] : memref<49x1024xf32, #tpu.memory_space<vmem>>, vector<49x1024xf32>
    tpu.vector_store %arg2[%c0_1, %c0_2], %2 {strides = array<i32>} : memref<49x1024xf32, #tpu.memory_space<vmem>>, vector<49x1024xf32>,
    return
  }
  func.func @transform_0(%arg0: i32) -> (i32, i32) {
    %c0_i32 = arith.constant 0 : i32
    %c0_i32_0 = arith.constant 0 : i32
    return %arg0, %c0_i32 : i32, i32
  }
  func.func @transform_1(%arg0: i32) -> (i32, i32) {
    %c0_i32 = arith.constant 0 : i32
    %c0_i32_0 = arith.constant 0 : i32
    return %arg0, %c0_i32 : i32, i32
  }
}

</mosaic_0001>

<bundles_post_ra>
// kernel: _relu_impl.1
= control target key start
LH: loop header
LB: loop body
LE: loop exit
PB: predicated region body
PF: predicated region fallthrough
CT: control target
= control target key end

     0   :  { %s526_s0 = inlined_call_operand.vmem [shape: f32[49,1024], index: 0, kind: input, shape index: {}, may-alias: {0,1}]   ;;  %s527_s1 = inlined_call_operand.vmem [shape: f32[49,1024], index: 1, kind: output, shape index: {}, may-alias: {0,1}]  }
   0x1   :  { %v8_v0 = vld [vmem:[%s526_s0] sm:$0xff]  ;;  %v9_v1 = vld [vmem:[%s526_s0 + $0x8] sm:$0xff]  ;;  %v10_v2 = vld [vmem:[%s526_s0 + $0x10] sm:$0xff] }
   0x2   :  { %v64_v3 = vmax.f32 %v8_v0, 0.0  ;;  %v65_v4 = vmax.f32 %v9_v1, 0.0  ;;  %v66_v5 = vmax.f32 %v10_v2, 0.0  ;;  %v11_v6 = vld [vmem:[%s526_s0 + $0x18] sm:$0xff]  ;;  %v12_v7 = vld [vmem:[%s526_s0 + $0x20] sm:$0xff]  ;;  %v13_v8 = vld [vmem:[%s526_s0 + $0x28] sm:$0xff] }
   0x3   :  { %v67_v9 = vmax.f32 %v11_v6, 0.0  ;;  %v14_v10 = vld [vmem:[%s526_s0 + $0x30] sm:$0xff]  ;;  %v68_v11 = vmax.f32 %v12_v7, 0.0  ;;  %v69_v13 = vmax.f32 %v13_v8, 0.0 }
   0x4   :  { %120 = vst [vmem:[%s527_s1] sm:$0xff] %v64_v3  ;;  %v70_v15 = vmax.f32 %v14_v10, 0.0 }
   0xb   :  { %v15_v12 = vld [vmem:[%s526_s0 + $0x38] sm:$0xff] }
   0xc   :  { %121 = vst [vmem:[%s527_s1 + $0x8] sm:$0xff] %v65_v4  ;;  %v71_v17 = vmax.f32 %v15_v12, 0.0 }
  0x13   :  { %v16_v14 = vld [vmem:[%s526_s0 + $0x40] sm:$0xff] }
  0x14   :  { %122 = vst [vmem:[%s527_s1 + $0x10] sm:$0xff] %v66_v5  ;;  %v72_v19 = vmax.f32 %v16_v14, 0.0 }
  0x1b   :  { %v17_v16 = vld [vmem:[%s526_s0 + $0x48] sm:$0xff] }
  0x1c   :  { %123 = vst [vmem:[%s527_s1 + $0x18] sm:$0xff] %v67_v9  ;;  %v73_v21 = vmax.f32 %v17_v16, 0.0 }
  0x23   :  { %v18_v18 = vld [vmem:[%s526_s0 + $0x50] sm:$0xff] }
  0x24   :  { %124 = vst [vmem:[%s527_s1 + $0x20] sm:$0xff] %v68_v11  ;;  %v74_v23 = vmax.f32 %v18_v18, 0.0 }
  0x2b   :  { %v19_v20 = vld [vmem:[%s526_s0 + $0x58] sm:$0xff] }
  0x2c   :  { %125 = vst [vmem:[%s527_s1 + $0x28] sm:$0xff] %v69_v13  ;;  %v75_v25 = vmax.f32 %v19_v20, 0.0 }
  0x33   :  { %v20_v22 = vld [vmem:[%s526_s0 + $0x60] sm:$0xff] }
  0x34   :  { %126 = vst [vmem:[%s527_s1 + $0x30] sm:$0xff] %v70_v15  ;;  %v76_v27 = vmax.f32 %v20_v22, 0.0 }
  0x3b   :  { %v21_v24 = vld [vmem:[%s526_s0 + $0x68] sm:$0xff] }
  0x3c   :  { %127 = vst [vmem:[%s527_s1 + $0x38] sm:$0xff] %v71_v17  ;;  %v77_v29 = vmax.f32 %v21_v24, 0.0 }
  0x43   :  { %v22_v26 = vld [vmem:[%s526_s0 + $0x70] sm:$0xff] }
  0x44   :  { %128 = vst [vmem:[%s527_s1 + $0x40] sm:$0xff] %v72_v19  ;;  %v78_v31 = vmax.f32 %v22_v26, 0.0 }
  0x4b   :  { %v23_v28 = vld [vmem:[%s526_s0 + $0x78] sm:$0xff] }
  0x4c   :  { %129 = vst [vmem:[%s527_s1 + $0x48] sm:$0xff] %v73_v21  ;;  %v79_v33 = vmax.f32 %v23_v28, 0.0 }
  0x53   :  { %v24_v30 = vld [vmem:[%s526_s0 + $0x80] sm:$0xff] }
  0x54   :  { %130 = vst [vmem:[%s527_s1 + $0x50] sm:$0xff] %v74_v23  ;;  %v80_v35 = vmax.f32 %v24_v30, 0.0 }
  0x5b   :  { %v25_v32 = vld [vmem:[%s526_s0 + $0x88] sm:$0xff] }
  0x5c   :  { %131 = vst [vmem:[%s527_s1 + $0x58] sm:$0xff] %v75_v25  ;;  %v81_v37 = vmax.f32 %v25_v32, 0.0 }
  0x63   :  { %v26_v34 = vld [vmem:[%s526_s0 + $0x90] sm:$0xff] }
  0x64   :  { %132 = vst [vmem:[%s527_s1 + $0x60] sm:$0xff] %v76_v27  ;;  %v82_v39 = vmax.f32 %v26_v34, 0.0 }
  0x6b   :  { %v27_v36 = vld [vmem:[%s526_s0 + $0x98] sm:$0xff] }
  0x6c   :  { %133 = vst [vmem:[%s527_s1 + $0x68] sm:$0xff] %v77_v29  ;;  %v83_v41 = vmax.f32 %v27_v36, 0.0 }
  0x73   :  { %v28_v38 = vld [vmem:[%s526_s0 + $0xa0] sm:$0xff] }
  0x74   :  { %134 = vst [vmem:[%s527_s1 + $0x70] sm:$0xff] %v78_v31  ;;  %v84_v43 = vmax.f32 %v28_v38, 0.0 }
  0x7b   :  { %v29_v40 = vld [vmem:[%s526_s0 + $0xa8] sm:$0xff] }
  0x7c   :  { %135 = vst [vmem:[%s527_s1 + $0x78] sm:$0xff] %v79_v33  ;;  %v85_v45 = vmax.f32 %v29_v40, 0.0 }
  0x83   :  { %v30_v42 = vld [vmem:[%s526_s0 + $0xb0] sm:$0xff] }
  0x84   :  { %136 = vst [vmem:[%s527_s1 + $0x80] sm:$0xff] %v80_v35  ;;  %v86_v47 = vmax.f32 %v30_v42, 0.0 }
  0x8b   :  { %v31_v44 = vld [vmem:[%s526_s0 + $0xb8] sm:$0xff] }
  0x8c   :  { %137 = vst [vmem:[%s527_s1 + $0x88] sm:$0xff] %v81_v37  ;;  %v87_v49 = vmax.f32 %v31_v44, 0.0 }
  0x93   :  { %v32_v46 = vld [vmem:[%s526_s0 + $0xc0] sm:$0xff] }
  0x94   :  { %138 = vst [vmem:[%s527_s1 + $0x90] sm:$0xff] %v82_v39  ;;  %v88_v51 = vmax.f32 %v32_v46, 0.0 }
  0x9b   :  { %v33_v48 = vld [vmem:[%s526_s0 + $0xc8] sm:$0xff] }
  0x9c   :  { %139 = vst [vmem:[%s527_s1 + $0x98] sm:$0xff] %v83_v41  ;;  %v89_v53 = vmax.f32 %v33_v48, 0.0 }
  0xa3   :  { %v34_v50 = vld [vmem:[%s526_s0 + $0xd0] sm:$0xff] }
  0xa4   :  { %140 = vst [vmem:[%s527_s1 + $0xa0] sm:$0xff] %v84_v43  ;;  %v90_v55 = vmax.f32 %v34_v50, 0.0 }
  0xab   :  { %v35_v52 = vld [vmem:[%s526_s0 + $0xd8] sm:$0xff] }
  0xac   :  { %141 = vst [vmem:[%s527_s1 + $0xa8] sm:$0xff] %v85_v45  ;;  %v91_v57 = vmax.f32 %v35_v52, 0.0 }
  0xb3   :  { %v36_v54 = vld [vmem:[%s526_s0 + $0xe0] sm:$0xff] }
  0xb4   :  { %142 = vst [vmem:[%s527_s1 + $0xb0] sm:$0xff] %v86_v47  ;;  %v92_v59 = vmax.f32 %v36_v54, 0.0 }
  0xbb   :  { %v37_v56 = vld [vmem:[%s526_s0 + $0xe8] sm:$0xff] }
  0xbc   :  { %143 = vst [vmem:[%s527_s1 + $0xb8] sm:$0xff] %v87_v49  ;;  %v93_v61 = vmax.f32 %v37_v56, 0.0 }
  0xc3   :  { %v38_v58 = vld [vmem:[%s526_s0 + $0xf0] sm:$0xff] }
  0xc4   :  { %144 = vst [vmem:[%s527_s1 + $0xc0] sm:$0xff] %v88_v51  ;;  %v94_v63 = vmax.f32 %v38_v58, 0.0 }
  0xcb   :  { %v39_v60 = vld [vmem:[%s526_s0 + $0xf8] sm:$0xff] }
  0xcc   :  { %145 = vst [vmem:[%s527_s1 + $0xc8] sm:$0xff] %v89_v53  ;;  %v95_v1 = vmax.f32 %v39_v60, 0.0 }
  0xd3   :  { %v40_v62 = vld [vmem:[%s526_s0 + $0x100] sm:$0xff] }
  0xd4   :  { %146 = vst [vmem:[%s527_s1 + $0xd0] sm:$0xff] %v90_v55  ;;  %v96_v3 = vmax.f32 %v40_v62, 0.0 }
  0xdb   :  { %v41_v0 = vld [vmem:[%s526_s0 + $0x108] sm:$0xff] }
  0xdc   :  { %147 = vst [vmem:[%s527_s1 + $0xd8] sm:$0xff] %v91_v57  ;;  %v97_v5 = vmax.f32 %v41_v0, 0.0 }
  0xe3   :  { %v42_v2 = vld [vmem:[%s526_s0 + $0x110] sm:$0xff] }
  0xe4   :  { %148 = vst [vmem:[%s527_s1 + $0xe0] sm:$0xff] %v92_v59  ;;  %v98_v7 = vmax.f32 %v42_v2, 0.0 }
  0xeb   :  { %v43_v4 = vld [vmem:[%s526_s0 + $0x118] sm:$0xff] }
  0xec   :  { %149 = vst [vmem:[%s527_s1 + $0xe8] sm:$0xff] %v93_v61  ;;  %v99_v9 = vmax.f32 %v43_v4, 0.0 }
  0xf3   :  { %v44_v6 = vld [vmem:[%s526_s0 + $0x120] sm:$0xff] }
  0xf4   :  { %150 = vst [vmem:[%s527_s1 + $0xf0] sm:$0xff] %v94_v63  ;;  %v100_v11 = vmax.f32 %v44_v6, 0.0 }
  0xfb   :  { %v45_v8 = vld [vmem:[%s526_s0 + $0x128] sm:$0xff] }
  0xfc   :  { %151 = vst [vmem:[%s527_s1 + $0xf8] sm:$0xff] %v95_v1  ;;  %v101_v13 = vmax.f32 %v45_v8, 0.0 }
 0x103   :  { %v46_v10 = vld [vmem:[%s526_s0 + $0x130] sm:$0xff] }
 0x104   :  { %152 = vst [vmem:[%s527_s1 + $0x100] sm:$0xff] %v96_v3  ;;  %v102_v15 = vmax.f32 %v46_v10, 0.0 }
 0x10b   :  { %v47_v12 = vld [vmem:[%s526_s0 + $0x138] sm:$0xff] }
 0x10c   :  { %153 = vst [vmem:[%s527_s1 + $0x108] sm:$0xff] %v97_v5  ;;  %v103_v17 = vmax.f32 %v47_v12, 0.0 }
 0x113   :  { %v48_v14 = vld [vmem:[%s526_s0 + $0x140] sm:$0xff] }
 0x114   :  { %154 = vst [vmem:[%s527_s1 + $0x110] sm:$0xff] %v98_v7  ;;  %v104_v19 = vmax.f32 %v48_v14, 0.0 }
 0x11b   :  { %v49_v16 = vld [vmem:[%s526_s0 + $0x148] sm:$0xff] }
 0x11c   :  { %155 = vst [vmem:[%s527_s1 + $0x118] sm:$0xff] %v99_v9  ;;  %v105_v21 = vmax.f32 %v49_v16, 0.0 }
 0x123   :  { %v50_v18 = vld [vmem:[%s526_s0 + $0x150] sm:$0xff] }
 0x124   :  { %156 = vst [vmem:[%s527_s1 + $0x120] sm:$0xff] %v100_v11  ;;  %v106_v23 = vmax.f32 %v50_v18, 0.0 }
 0x12b   :  { %v51_v20 = vld [vmem:[%s526_s0 + $0x158] sm:$0xff] }
 0x12c   :  { %157 = vst [vmem:[%s527_s1 + $0x128] sm:$0xff] %v101_v13  ;;  %v107_v25 = vmax.f32 %v51_v20, 0.0 }
 0x133   :  { %v52_v22 = vld [vmem:[%s526_s0 + $0x160] sm:$0xff] }
 0x134   :  { %158 = vst [vmem:[%s527_s1 + $0x130] sm:$0xff] %v102_v15  ;;  %v108_v27 = vmax.f32 %v52_v22, 0.0 }
 0x13b   :  { %v53_v24 = vld [vmem:[%s526_s0 + $0x168] sm:$0xff] }
 0x13c   :  { %159 = vst [vmem:[%s527_s1 + $0x138] sm:$0xff] %v103_v17  ;;  %v109_v29 = vmax.f32 %v53_v24, 0.0 }
 0x143   :  { %v54_v26 = vld [vmem:[%s526_s0 + $0x170] sm:$0xff] }
 0x144   :  { %160 = vst [vmem:[%s527_s1 + $0x140] sm:$0xff] %v104_v19  ;;  %v110_v31 = vmax.f32 %v54_v26, 0.0 }
 0x14b   :  { %v55_v28 = vld [vmem:[%s526_s0 + $0x178] sm:$0xff] }
 0x14c   :  { %161 = vst [vmem:[%s527_s1 + $0x148] sm:$0xff] %v105_v21  ;;  %v111_v33 = vmax.f32 %v55_v28, 0.0 }
 0x153   :  { %v56_v30 = vld [vmem:[%s526_s0 + $0x180] sm:$0x1] }
 0x154   :  { %162 = vst [vmem:[%s527_s1 + $0x150] sm:$0xff] %v106_v23  ;;  %v112_v35 = vmax.f32 %v56_v30, 0.0 }
 0x15b   :  { %v57_v32 = vld [vmem:[%s526_s0 + $0x188] sm:$0x1] }
 0x15c   :  { %163 = vst [vmem:[%s527_s1 + $0x158] sm:$0xff] %v107_v25  ;;  %v113_v37 = vmax.f32 %v57_v32, 0.0 }
 0x163   :  { %v58_v34 = vld [vmem:[%s526_s0 + $0x190] sm:$0x1] }
 0x164   :  { %164 = vst [vmem:[%s527_s1 + $0x160] sm:$0xff] %v108_v27  ;;  %v114_v39 = vmax.f32 %v58_v34, 0.0 }
 0x16b   :  { %v59_v36 = vld [vmem:[%s526_s0 + $0x198] sm:$0x1] }
 0x16c   :  { %165 = vst [vmem:[%s527_s1 + $0x168] sm:$0xff] %v109_v29  ;;  %v115_v41 = vmax.f32 %v59_v36, 0.0 }
 0x173   :  { %v60_v38 = vld [vmem:[%s526_s0 + $0x1a0] sm:$0x1] }
 0x174   :  { %166 = vst [vmem:[%s527_s1 + $0x170] sm:$0xff] %v110_v31  ;;  %v116_v43 = vmax.f32 %v60_v38, 0.0 }
 0x17b   :  { %v61_v40 = vld [vmem:[%s526_s0 + $0x1a8] sm:$0x1] }
 0x17c   :  { %167 = vst [vmem:[%s527_s1 + $0x178] sm:$0xff] %v111_v33  ;;  %v117_v45 = vmax.f32 %v61_v40, 0.0 }
 0x183   :  { %v62_v42 = vld [vmem:[%s526_s0 + $0x1b0] sm:$0x1] }
 0x184   :  { %168 = vst [vmem:[%s527_s1 + $0x180] sm:$0x1] %v112_v35  ;;  %v118_v46 = vmax.f32 %v62_v42, 0.0 }
 0x18b   :  { %v63_v44 = vld [vmem:[%s526_s0 + $0x1b8] sm:$0x1] }
 0x18c   :  { %169 = vst [vmem:[%s527_s1 + $0x188] sm:$0x1] %v113_v37  ;;  %v119_v47 = vmax.f32 %v63_v44, 0.0 }
 0x18d   :  { %170 = vst [vmem:[%s527_s1 + $0x190] sm:$0x1] %v114_v39 }
 0x18e   :  { %171 = vst [vmem:[%s527_s1 + $0x198] sm:$0x1] %v115_v41 }
 0x18f   :  { %172 = vst [vmem:[%s527_s1 + $0x1a0] sm:$0x1] %v116_v43 }
 0x190   :  { %173 = vst [vmem:[%s527_s1 + $0x1a8] sm:$0x1] %v117_v45 }
 0x191   :  { %174 = vst [vmem:[%s527_s1 + $0x1b0] sm:$0x1] %v118_v46 }
 0x192   :  { %175 = vst [vmem:[%s527_s1 + $0x1b8] sm:$0x1] %v119_v47 }

</bundles_post_ra>
